<compile_context>
chip_gen: v5e
topology: v5e:2x2
jax: 0.10.0
libtpu: 0.0.40
codegen_flags: <defaults>
</compile_context>

<pallas_src>
import functools
import math

import jax
import jax.numpy as jnp
from jax.experimental import pallas as pl
from jax.experimental.pallas import tpu as pltpu

_HALF_LOG_2PI = 0.5 * math.log(2.0 * math.pi)


def _lgamma_digamma(x):
    """Fused (lgamma(x), digamma(x)) for x >= 1.

    Shift-by-2 recurrence then Stirling / asymptotic series at z = x + 2 >= 3.
    Absolute error < 1e-6, far inside the 2e-3 test tolerance.  The recurrence
    product is only x*(x+1) (~x^2), so no float32 overflow for x up to ~1e19.
    """
    p = x * (x + 1.0)          # recurrence product (shared by lgamma & digamma)
    z = x + 2.0                # z >= 3
    zi = 1.0 / z
    zi2 = zi * zi
    logz = jnp.log(z)

    # lgamma(z) via Stirling, then lgamma(x) = lgamma(z) - log(x*(x+1))
    lg = (
        (z - 0.5) * logz - z + _HALF_LOG_2PI
        + zi * (1.0 / 12.0 - zi2 * (1.0 / 360.0 - zi2 * (1.0 / 1260.0)))
        - jnp.log(p)
    )
    # digamma(z) asymptotic, then digamma(x) = digamma(z) - (1/x + 1/(x+1))
    #   1/x + 1/(x+1) == (2x+1) / (x*(x+1))  -> single reciprocal
    dg = (
        logz - 0.5 * zi
        - zi2 * (1.0 / 12.0 - zi2 * (1.0 / 120.0 - zi2 * (1.0 / 252.0)))
        - (2.0 * x + 1.0) / p
    )
    return lg, dg


def _sum_rows(x):
    """Sum a [C, TL] tile over the (small) sublane class axis -> [1, TL]."""
    c = x.shape[0]
    if c <= 8:
        acc = x[0:1, :]
        for r in range(1, c):
            acc = acc + x[r : r + 1, :]
        return acc
    return jnp.sum(x, axis=0, keepdims=True)


def _edl_mse_kernel(coef_ref, x_ref, t_ref, loss_ref, *, num_classes, target_is_labels):
    # coef_ref: SMEM scalar (annealing coefficient)
    # x_ref:    [C, TL] logits (classes on sublanes, batch on lanes)
    # t_ref:    [1, TL] int32 labels  OR  [C, TL] float targets
    # loss_ref: [1, TL] per-example loss (lane-dense output)
    c = num_classes
    x = x_ref[...].astype(jnp.float32)
    evidence = jnp.maximum(x, 0.0)       # relu_evidence
    alpha = evidence + 1.0

    if target_is_labels:
        labels = t_ref[...]              # [1, TL] int32
        row_ids = jax.lax.broadcasted_iota(jnp.int32, alpha.shape, 0)
        is_tgt = row_ids == labels       # broadcast [1,TL] -> [C,TL]
        ay = jnp.where(is_tgt, alpha, 0.0)
        y2_sum = 1.0                     # sum(y^2) for a hard one-hot target
        # (alpha - 1)*(1 - y) + 1  ==  where(y==1, 1, alpha) for one-hot y
        kl_alpha = jnp.where(is_tgt, 1.0, alpha)
    else:
        y = t_ref[...].astype(jnp.float32)
        ay = alpha * y
        y2_sum = _sum_rows(y * y)
        kl_alpha = (alpha - 1.0) * (1.0 - y) + 1.0

    # ---- loglikelihood_loss (expanded; reciprocals of row sums hoisted) ----
    S = _sum_rows(alpha)                 # [1, TL]
    a2_sum = _sum_rows(alpha * alpha)
    ay_sum = _sum_rows(ay)
    inv_S = 1.0 / S
    inv_S1 = 1.0 / (S + 1.0)
    inv_S2 = inv_S * inv_S
    # sum((y - alpha/S)^2) = sum(y^2) - 2*sum(alpha*y)/S + sum(alpha^2)/S^2
    err = y2_sum - 2.0 * ay_sum * inv_S + a2_sum * inv_S2
    # sum(alpha*(S-alpha)) / (S^2 (S+1)) = (S^2 - sum(alpha^2)) / (S^2 (S+1))
    var = (S * S - a2_sum) * inv_S2 * inv_S1
    loglik = err + var

    # ---- KL( Dirichlet(kl_alpha) || Dirichlet(1) ), fused lgamma/digamma ----
    lg_ka, dg_ka = _lgamma_digamma(kl_alpha)   # per-element [C, TL] (dominant)
    S_a = _sum_rows(kl_alpha)                  # [1, TL]
    lg_Sa, dg_Sa = _lgamma_digamma(S_a)
    lnB = lg_Sa - _sum_rows(lg_ka)
    lnB_uni = -math.lgamma(float(c))           # = sum(lgamma(1)) - lgamma(C)
    kl = _sum_rows((kl_alpha - 1.0) * (dg_ka - dg_Sa)) + lnB + lnB_uni

    coef = coef_ref[0]
    loss_ref[...] = loglik + coef * kl


def _choose_lane_tile(n):
    """Pick a lane-tile size (multiple of 128, <= 2048) and the padded N."""
    if n <= 128:
        return n, n
    n128 = ((n + 127) // 128) * 128
    nblk = n128 // 128
    max_k = min(nblk, 16)                      # cap tile at 16*128 = 2048 lanes
    k = max(d for d in range(1, max_k + 1) if nblk % d == 0)
    return k * 128, n128


class EdlLossesPallas:
    """JAX/Pallas equivalent of the PyTorch Edl_losses module (edl_mse_loss)."""

    def __init__(self, loss_name, num_classes):
        assert loss_name == "edl_mse_loss"
        self.num_classes = num_classes
        self.annealing_step = 50

    def __call__(self, output, target, epoch_num, reduction="none"):
        n, c = output.shape
        assert c == self.num_classes
        coef = jnp.array(
            [min(1.0, float(epoch_num) / float(self.annealing_step))], dtype=jnp.float32
        )

        target_is_labels = target.ndim == 1

        # Lane-dense layout: classes on sublanes, batch on lanes.
        x_t = output.T                                    # [C, N]
        tl, n_pad = _choose_lane_tile(n)
        pad = n_pad - n
        if pad:
            x_t = jnp.pad(x_t, ((0, 0), (0, pad)))

        if target_is_labels:
            t_in = target.astype(jnp.int32).reshape(1, n)
            if pad:
                t_in = jnp.pad(t_in, ((0, 0), (0, pad)))
            t_spec = pl.BlockSpec((1, tl), lambda i, coef: (0, i))
        else:
            t_in = target.astype(jnp.float32).T           # [C, N]
            if pad:
                t_in = jnp.pad(t_in, ((0, 0), (0, pad)))
            t_spec = pl.BlockSpec((c, tl), lambda i, coef: (0, i))

        kernel = functools.partial(
            _edl_mse_kernel, num_classes=c, target_is_labels=target_is_labels
        )

        loss2d = pl.pallas_call(
            kernel,
            out_shape=jax.ShapeDtypeStruct((1, n_pad), jnp.float32),
            grid_spec=pltpu.PrefetchScalarGridSpec(
                num_scalar_prefetch=1,
                grid=(n_pad // tl,),
                in_specs=[
                    pl.BlockSpec((c, tl), lambda i, coef: (0, i)),
                    t_spec,
                ],
                out_specs=pl.BlockSpec((1, tl), lambda i, coef: (0, i)),
            ),
            compiler_params=pltpu.CompilerParams(
                dimension_semantics=("parallel",)
            ),
        )(coef, x_t, t_in)

        loss = loss2d[0, :n]
        if reduction == "none":
            return loss
        return jnp.mean(loss).reshape(-1)


def _reference(output, target_onehot, epoch_num, num_classes, annealing_step=50):
    """Pure-JAX reference mirroring the PyTorch code (for correctness check)."""
    from jax.scipy.special import gammaln, digamma

    evidence = jnp.maximum(output.astype(jnp.float32), 0.0)
    alpha = evidence + 1.0
    y = target_onehot
    S = jnp.sum(alpha, axis=1, keepdims=True)
    err = jnp.sum((y - alpha / S) ** 2, axis=1, keepdims=True)
    var = jnp.sum(alpha * (S - alpha) / (S * S * (S + 1.0)), axis=1, keepdims=True)
    loglik = err + var
    coef = min(1.0, float(epoch_num) / annealing_step)
    kl_alpha = (alpha - 1.0) * (1.0 - y) + 1.0
    S_a = jnp.sum(kl_alpha, axis=1, keepdims=True)
    lnB = gammaln(S_a) - jnp.sum(gammaln(kl_alpha), axis=1, keepdims=True)
    lnB_uni = -gammaln(jnp.float32(num_classes))
    kl = (
        jnp.sum((kl_alpha - 1.0) * (digamma(kl_alpha) - digamma(S_a)), axis=1, keepdims=True)
        + lnB
        + lnB_uni
    )
    return (loglik + coef * kl).reshape(-1)


if __name__ == "__main__":
    key = jax.random.PRNGKey(0)
    k1, k2 = jax.random.split(key)

    batch, num_classes = 8, 4
    output = jax.random.normal(k1, (batch, num_classes), dtype=jnp.float32) * 3.0
    target = jax.random.randint(k2, (batch,), 0, num_classes)  # class indices
    epoch_num = 10

    module = EdlLossesPallas("edl_mse_loss", num_classes)
    loss = module(output, target, epoch_num, reduction="none")
    loss = jax.block_until_ready(loss)

    ref = _reference(
        output,
        jax.nn.one_hot(target, num_classes, dtype=jnp.float32),
        epoch_num,
        num_classes,
    )
    assert loss.shape == (batch,)
    assert jnp.allclose(loss, ref, rtol=2e-3, atol=2e-3), (loss, ref)

    # Also exercise the 2-D (already one-hot) target path, as in the module spec.
    loss2 = module(output, jax.nn.one_hot(target, num_classes, dtype=jnp.float32),
                   epoch_num, reduction="none")
    loss2 = jax.block_until_ready(loss2)
    assert jnp.allclose(loss2, ref, rtol=2e-3, atol=2e-3), (loss2, ref)

    print("KERNEL_OK")
</pallas_src>

<mosaic_0001>
module attributes {stable_mosaic.version = 11 : i64} {
  func.func @_edl_mse_kernel(%arg0: i32, %arg1: memref<1xf32, #tpu.memory_space<smem>>, %arg2: memref<4x8xf32, #tpu.memory_space<vmem>>, %arg3: memref<1x8xi32, #tpu.memory_space<vmem>>, %arg4: memref<1x8xf32, #tpu.memory_space<vmem>>) attributes {dimension_semantics = [#tpu.dimension_semantics<parallel>], iteration_bounds = array<i64: 1>, scalar_prefetch = 1 : i64, scratch_operands = 0 : i64, tpu.core_type = #tpu.core_type<tc>, window_params = [{transform_indices = @transform_0, window_bounds = array<i64: 4, 8>}, {transform_indices = @transform_1, window_bounds = array<i64: 1, 8>}, {transform_indices = @transform_2, window_bounds = array<i64: 1, 8>}]} {
    %c0 = arith.constant 0 : index
    %c0_0 = arith.constant 0 : index
    %0 = vector.load %arg2[%c0, %c0_0] : memref<4x8xf32, #tpu.memory_space<vmem>>, vector<4x8xf32>
    %cst = arith.constant 0.000000e+00 : f32
    %1 = vector.broadcast %cst : f32 to vector<4x8xf32>
    %2 = arith.maximumf %0, %1 : vector<4x8xf32>
    %cst_1 = arith.constant 1.000000e+00 : f32
    %3 = vector.broadcast %cst_1 : f32 to vector<4x8xf32>
    %4 = arith.addf %2, %3 : vector<4x8xf32>
    %c0_2 = arith.constant 0 : index
    %c0_3 = arith.constant 0 : index
    %5 = vector.load %arg3[%c0_2, %c0_3] : memref<1x8xi32, #tpu.memory_space<vmem>>, vector<1x8xi32>
    %6 = tpu.iota {dimensions = array<i32: 0>} : vector<4x8xi32>
    %7 = vector.broadcast %5 : vector<1x8xi32> to vector<4x8xi32>
    %8 = arith.cmpi eq, %6, %7 : vector<4x8xi32>
    %cst_4 = arith.constant 0.000000e+00 : f32
    %9 = vector.broadcast %cst_4 : f32 to vector<4x8xf32>
    %10 = arith.select %8, %4, %9 : vector<4x8xi1>, vector<4x8xf32>
    %cst_5 = arith.constant 1.000000e+00 : f32
    %11 = vector.broadcast %cst_5 : f32 to vector<4x8xf32>
    %12 = arith.select %8, %11, %4 : vector<4x8xi1>, vector<4x8xf32>
    %13 = vector.extract_strided_slice %4 {offsets = [0, 0], sizes = [1, 8], strides = [1, 1]} : vector<4x8xf32> to vector<1x8xf32>
    %14 = vector.extract_strided_slice %4 {offsets = [1, 0], sizes = [1, 8], strides = [1, 1]} : vector<4x8xf32> to vector<1x8xf32>
    %15 = arith.addf %13, %14 : vector<1x8xf32>
    %16 = vector.extract_strided_slice %4 {offsets = [2, 0], sizes = [1, 8], strides = [1, 1]} : vector<4x8xf32> to vector<1x8xf32>
    %17 = arith.addf %15, %16 : vector<1x8xf32>
    %18 = vector.extract_strided_slice %4 {offsets = [3, 0], sizes = [1, 8], strides = [1, 1]} : vector<4x8xf32> to vector<1x8xf32>
    %19 = arith.addf %17, %18 : vector<1x8xf32>
    %20 = arith.mulf %4, %4 : vector<4x8xf32>
    %21 = vector.extract_strided_slice %20 {offsets = [0, 0], sizes = [1, 8], strides = [1, 1]} : vector<4x8xf32> to vector<1x8xf32>
    %22 = vector.extract_strided_slice %20 {offsets = [1, 0], sizes = [1, 8], strides = [1, 1]} : vector<4x8xf32> to vector<1x8xf32>
    %23 = arith.addf %21, %22 : vector<1x8xf32>
    %24 = vector.extract_strided_slice %20 {offsets = [2, 0], sizes = [1, 8], strides = [1, 1]} : vector<4x8xf32> to vector<1x8xf32>
    %25 = arith.addf %23, %24 : vector<1x8xf32>
    %26 = vector.extract_strided_slice %20 {offsets = [3, 0], sizes = [1, 8], strides = [1, 1]} : vector<4x8xf32> to vector<1x8xf32>
    %27 = arith.addf %25, %26 : vector<1x8xf32>
    %28 = vector.extract_strided_slice %10 {offsets = [0, 0], sizes = [1, 8], strides = [1, 1]} : vector<4x8xf32> to vector<1x8xf32>
    %29 = vector.extract_strided_slice %10 {offsets = [1, 0], sizes = [1, 8], strides = [1, 1]} : vector<4x8xf32> to vector<1x8xf32>
    %30 = arith.addf %28, %29 : vector<1x8xf32>
    %31 = vector.extract_strided_slice %10 {offsets = [2, 0], sizes = [1, 8], strides = [1, 1]} : vector<4x8xf32> to vector<1x8xf32>
    %32 = arith.addf %30, %31 : vector<1x8xf32>
    %33 = vector.extract_strided_slice %10 {offsets = [3, 0], sizes = [1, 8], strides = [1, 1]} : vector<4x8xf32> to vector<1x8xf32>
    %34 = arith.addf %32, %33 : vector<1x8xf32>
    %cst_6 = arith.constant 1.000000e+00 : f32
    %35 = vector.broadcast %cst_6 : f32 to vector<1x8xf32>
    %36 = arith.divf %35, %19 : vector<1x8xf32>
    %cst_7 = arith.constant 1.000000e+00 : f32
    %37 = vector.broadcast %cst_7 : f32 to vector<1x8xf32>
    %38 = arith.addf %19, %37 : vector<1x8xf32>
    %cst_8 = arith.constant 1.000000e+00 : f32
    %39 = vector.broadcast %cst_8 : f32 to vector<1x8xf32>
    %40 = arith.divf %39, %38 : vector<1x8xf32>
    %41 = arith.mulf %36, %36 : vector<1x8xf32>
    %cst_9 = arith.constant 2.000000e+00 : f32
    %42 = vector.broadcast %cst_9 : f32 to vector<1x8xf32>
    %43 = arith.mulf %42, %34 : vector<1x8xf32>
    %44 = arith.mulf %43, %36 : vector<1x8xf32>
    %cst_10 = arith.constant 1.000000e+00 : f32
    %45 = vector.broadcast %cst_10 : f32 to vector<1x8xf32>
    %46 = arith.subf %45, %44 : vector<1x8xf32>
    %47 = arith.mulf %27, %41 : vector<1x8xf32>
    %48 = arith.addf %46, %47 : vector<1x8xf32>
    %49 = arith.mulf %19, %19 : vector<1x8xf32>
    %50 = arith.subf %49, %27 : vector<1x8xf32>
    %51 = arith.mulf %50, %41 : vector<1x8xf32>
    %52 = arith.mulf %51, %40 : vector<1x8xf32>
    %53 = arith.addf %48, %52 : vector<1x8xf32>
    %cst_11 = arith.constant 1.000000e+00 : f32
    %54 = vector.broadcast %cst_11 : f32 to vector<4x8xf32>
    %55 = arith.addf %12, %54 : vector<4x8xf32>
    %56 = arith.mulf %12, %55 : vector<4x8xf32>
    %cst_12 = arith.constant 2.000000e+00 : f32
    %57 = vector.broadcast %cst_12 : f32 to vector<4x8xf32>
    %58 = arith.addf %12, %57 : vector<4x8xf32>
    %cst_13 = arith.constant 1.000000e+00 : f32
    %59 = vector.broadcast %cst_13 : f32 to vector<4x8xf32>
    %60 = arith.divf %59, %58 : vector<4x8xf32>
    %61 = arith.mulf %60, %60 : vector<4x8xf32>
    %62 = math.log %58 : vector<4x8xf32>
    %cst_14 = arith.constant 5.000000e-01 : f32
    %63 = vector.broadcast %cst_14 : f32 to vector<4x8xf32>
    %64 = arith.subf %58, %63 : vector<4x8xf32>
    %65 = arith.mulf %64, %62 : vector<4x8xf32>
    %66 = arith.subf %65, %58 : vector<4x8xf32>
    %cst_15 = arith.constant 0.918938517 : f32
    %67 = vector.broadcast %cst_15 : f32 to vector<4x8xf32>
    %68 = arith.addf %66, %67 : vector<4x8xf32>
    %cst_16 = arith.constant 7.93650805E-4 : f32
    %69 = vector.broadcast %cst_16 : f32 to vector<4x8xf32>
    %70 = arith.mulf %61, %69 : vector<4x8xf32>
    %cst_17 = arith.constant 0.00277777785 : f32
    %71 = vector.broadcast %cst_17 : f32 to vector<4x8xf32>
    %72 = arith.subf %71, %70 : vector<4x8xf32>
    %73 = arith.mulf %61, %72 : vector<4x8xf32>
    %cst_18 = arith.constant 0.0833333358 : f32
    %74 = vector.broadcast %cst_18 : f32 to vector<4x8xf32>
    %75 = arith.subf %74, %73 : vector<4x8xf32>
    %76 = arith.mulf %60, %75 : vector<4x8xf32>
    %77 = arith.addf %68, %76 : vector<4x8xf32>
    %78 = math.log %56 : vector<4x8xf32>
    %79 = arith.subf %77, %78 : vector<4x8xf32>
    %cst_19 = arith.constant 5.000000e-01 : f32
    %80 = vector.broadcast %cst_19 : f32 to vector<4x8xf32>
    %81 = arith.mulf %80, %60 : vector<4x8xf32>
    %82 = arith.subf %62, %81 : vector<4x8xf32>
    %cst_20 = arith.constant 0.0039682542 : f32
    %83 = vector.broadcast %cst_20 : f32 to vector<4x8xf32>
    %84 = arith.mulf %61, %83 : vector<4x8xf32>
    %cst_21 = arith.constant 0.00833333377 : f32
    %85 = vector.broadcast %cst_21 : f32 to vector<4x8xf32>
    %86 = arith.subf %85, %84 : vector<4x8xf32>
    %87 = arith.mulf %61, %86 : vector<4x8xf32>
    %cst_22 = arith.constant 0.0833333358 : f32
    %88 = vector.broadcast %cst_22 : f32 to vector<4x8xf32>
    %89 = arith.subf %88, %87 : vector<4x8xf32>
    %90 = arith.mulf %61, %89 : vector<4x8xf32>
    %91 = arith.subf %82, %90 : vector<4x8xf32>
    %cst_23 = arith.constant 2.000000e+00 : f32
    %92 = vector.broadcast %cst_23 : f32 to vector<4x8xf32>
    %93 = arith.mulf %92, %12 : vector<4x8xf32>
    %cst_24 = arith.constant 1.000000e+00 : f32
    %94 = vector.broadcast %cst_24 : f32 to vector<4x8xf32>
    %95 = arith.addf %93, %94 : vector<4x8xf32>
    %96 = arith.divf %95, %56 : vector<4x8xf32>
    %97 = arith.subf %91, %96 : vector<4x8xf32>
    %98 = vector.extract_strided_slice %12 {offsets = [0, 0], sizes = [1, 8], strides = [1, 1]} : vector<4x8xf32> to vector<1x8xf32>
    %99 = vector.extract_strided_slice %12 {offsets = [1, 0], sizes = [1, 8], strides = [1, 1]} : vector<4x8xf32> to vector<1x8xf32>
    %100 = arith.addf %98, %99 : vector<1x8xf32>
    %101 = vector.extract_strided_slice %12 {offsets = [2, 0], sizes = [1, 8], strides = [1, 1]} : vector<4x8xf32> to vector<1x8xf32>
    %102 = arith.addf %100, %101 : vector<1x8xf32>
    %103 = vector.extract_strided_slice %12 {offsets = [3, 0], sizes = [1, 8], strides = [1, 1]} : vector<4x8xf32> to vector<1x8xf32>
    %104 = arith.addf %102, %103 : vector<1x8xf32>
    %cst_25 = arith.constant 1.000000e+00 : f32
    %105 = vector.broadcast %cst_25 : f32 to vector<1x8xf32>
    %106 = arith.addf %104, %105 : vector<1x8xf32>
    %107 = arith.mulf %104, %106 : vector<1x8xf32>
    %cst_26 = arith.constant 2.000000e+00 : f32
    %108 = vector.broadcast %cst_26 : f32 to vector<1x8xf32>
    %109 = arith.addf %104, %108 : vector<1x8xf32>
    %cst_27 = arith.constant 1.000000e+00 : f32
    %110 = vector.broadcast %cst_27 : f32 to vector<1x8xf32>
    %111 = arith.divf %110, %109 : vector<1x8xf32>
    %112 = arith.mulf %111, %111 : vector<1x8xf32>
    %113 = math.log %109 : vector<1x8xf32>
    %cst_28 = arith.constant 5.000000e-01 : f32
    %114 = vector.broadcast %cst_28 : f32 to vector<1x8xf32>
    %115 = arith.subf %109, %114 : vector<1x8xf32>
    %116 = arith.mulf %115, %113 : vector<1x8xf32>
    %117 = arith.subf %116, %109 : vector<1x8xf32>
    %cst_29 = arith.constant 0.918938517 : f32
    %118 = vector.broadcast %cst_29 : f32 to vector<1x8xf32>
    %119 = arith.addf %117, %118 : vector<1x8xf32>
    %cst_30 = arith.constant 7.93650805E-4 : f32
    %120 = vector.broadcast %cst_30 : f32 to vector<1x8xf32>
    %121 = arith.mulf %112, %120 : vector<1x8xf32>
    %cst_31 = arith.constant 0.00277777785 : f32
    %122 = vector.broadcast %cst_31 : f32 to vector<1x8xf32>
    %123 = arith.subf %122, %121 : vector<1x8xf32>
    %124 = arith.mulf %112, %123 : vector<1x8xf32>
    %cst_32 = arith.constant 0.0833333358 : f32
    %125 = vector.broadcast %cst_32 : f32 to vector<1x8xf32>
    %126 = arith.subf %125, %124 : vector<1x8xf32>
    %127 = arith.mulf %111, %126 : vector<1x8xf32>
    %128 = arith.addf %119, %127 : vector<1x8xf32>
    %129 = math.log %107 : vector<1x8xf32>
    %130 = arith.subf %128, %129 : vector<1x8xf32>
    %cst_33 = arith.constant 5.000000e-01 : f32
    %131 = vector.broadcast %cst_33 : f32 to vector<1x8xf32>
    %132 = arith.mulf %131, %111 : vector<1x8xf32>
    %133 = arith.subf %113, %132 : vector<1x8xf32>
    %cst_34 = arith.constant 0.0039682542 : f32
    %134 = vector.broadcast %cst_34 : f32 to vector<1x8xf32>
    %135 = arith.mulf %112, %134 : vector<1x8xf32>
    %cst_35 = arith.constant 0.00833333377 : f32
    %136 = vector.broadcast %cst_35 : f32 to vector<1x8xf32>
    %137 = arith.subf %136, %135 : vector<1x8xf32>
    %138 = arith.mulf %112, %137 : vector<1x8xf32>
    %cst_36 = arith.constant 0.0833333358 : f32
    %139 = vector.broadcast %cst_36 : f32 to vector<1x8xf32>
    %140 = arith.subf %139, %138 : vector<1x8xf32>
    %141 = arith.mulf %112, %140 : vector<1x8xf32>
    %142 = arith.subf %133, %141 : vector<1x8xf32>
    %cst_37 = arith.constant 2.000000e+00 : f32
    %143 = vector.broadcast %cst_37 : f32 to vector<1x8xf32>
    %144 = arith.mulf %143, %104 : vector<1x8xf32>
    %cst_38 = arith.constant 1.000000e+00 : f32
    %145 = vector.broadcast %cst_38 : f32 to vector<1x8xf32>
    %146 = arith.addf %144, %145 : vector<1x8xf32>
    %147 = arith.divf %146, %107 : vector<1x8xf32>
    %148 = arith.subf %142, %147 : vector<1x8xf32>
    %149 = vector.extract_strided_slice %79 {offsets = [0, 0], sizes = [1, 8], strides = [1, 1]} : vector<4x8xf32> to vector<1x8xf32>
    %150 = vector.extract_strided_slice %79 {offsets = [1, 0], sizes = [1, 8], strides = [1, 1]} : vector<4x8xf32> to vector<1x8xf32>
    %151 = arith.addf %149, %150 : vector<1x8xf32>
    %152 = vector.extract_strided_slice %79 {offsets = [2, 0], sizes = [1, 8], strides = [1, 1]} : vector<4x8xf32> to vector<1x8xf32>
    %153 = arith.addf %151, %152 : vector<1x8xf32>
    %154 = vector.extract_strided_slice %79 {offsets = [3, 0], sizes = [1, 8], strides = [1, 1]} : vector<4x8xf32> to vector<1x8xf32>
    %155 = arith.addf %153, %154 : vector<1x8xf32>
    %156 = arith.subf %130, %155 : vector<1x8xf32>
    %cst_39 = arith.constant 1.000000e+00 : f32
    %157 = vector.broadcast %cst_39 : f32 to vector<4x8xf32>
    %158 = arith.subf %12, %157 : vector<4x8xf32>
    %159 = vector.broadcast %148 : vector<1x8xf32> to vector<4x8xf32>
    %160 = arith.subf %97, %159 : vector<4x8xf32>
    %161 = arith.mulf %158, %160 : vector<4x8xf32>
    %162 = vector.extract_strided_slice %161 {offsets = [0, 0], sizes = [1, 8], strides = [1, 1]} : vector<4x8xf32> to vector<1x8xf32>
    %163 = vector.extract_strided_slice %161 {offsets = [1, 0], sizes = [1, 8], strides = [1, 1]} : vector<4x8xf32> to vector<1x8xf32>
    %164 = arith.addf %162, %163 : vector<1x8xf32>
    %165 = vector.extract_strided_slice %161 {offsets = [2, 0], sizes = [1, 8], strides = [1, 1]} : vector<4x8xf32> to vector<1x8xf32>
    %166 = arith.addf %164, %165 : vector<1x8xf32>
    %167 = vector.extract_strided_slice %161 {offsets = [3, 0], sizes = [1, 8], strides = [1, 1]} : vector<4x8xf32> to vector<1x8xf32>
    %168 = arith.addf %166, %167 : vector<1x8xf32>
    %169 = arith.addf %168, %156 : vector<1x8xf32>
    %cst_40 = arith.constant -1.79175949 : f32
    %170 = vector.broadcast %cst_40 : f32 to vector<1x8xf32>
    %171 = arith.addf %169, %170 : vector<1x8xf32>
    %c0_41 = arith.constant 0 : index
    %172 = memref.load %arg1[%c0_41] : memref<1xf32, #tpu.memory_space<smem>>
    %173 = vector.broadcast %172 : f32 to vector<1x8xf32>
    %174 = arith.mulf %173, %171 : vector<1x8xf32>
    %175 = arith.addf %53, %174 : vector<1x8xf32>
    %c0_42 = arith.constant 0 : index
    %c0_43 = arith.constant 0 : index
    %176 = vector.load %arg4[%c0_42, %c0_43] : memref<1x8xf32, #tpu.memory_space<vmem>>, vector<1x8xf32>
    tpu.vector_store %arg4[%c0_42, %c0_43], %175 {strides = array<i32>} : memref<1x8xf32, #tpu.memory_space<vmem>>, vector<1x8xf32>,
    return
  }
  func.func @transform_0(%arg0: i32, %arg1: memref<1xf32, #tpu.memory_space<smem>>) -> (i32, i32) {
    %c0_i32 = arith.constant 0 : i32
    %c0_i32_0 = arith.constant 0 : i32
    return %c0_i32, %arg0 : i32, i32
  }
  func.func @transform_1(%arg0: i32, %arg1: memref<1xf32, #tpu.memory_space<smem>>) -> (i32, i32) {
    %c0_i32 = arith.constant 0 : i32
    %c0_i32_0 = arith.constant 0 : i32
    return %c0_i32, %arg0 : i32, i32
  }
  func.func @transform_2(%arg0: i32, %arg1: memref<1xf32, #tpu.memory_space<smem>>) -> (i32, i32) {
    %c0_i32 = arith.constant 0 : i32
    %c0_i32_0 = arith.constant 0 : i32
    return %c0_i32, %arg0 : i32, i32
  }
}

</mosaic_0001>

<bundles_post_ra>
// kernel: tpu_custom_call.1
= control target key start
LH: loop header
LB: loop body
LE: loop exit
PB: predicated region body
PF: predicated region fallthrough
CT: control target
= control target key end

     0   :  { %9 = vsyncpa [#allocation5], 0  ;;  %s602_s0 = inlined_call_operand.<no memory space> [shape: f32[1], index: 0, kind: input, shape index: {}]   ;;  %s603_s1 = inlined_call_operand.hbm [shape: f32[4,8], index: 1, kind: input, shape index: {}]   ;;  %s604_s2 = inlined_call_operand.vmem [shape: s32[1,8], index: 2, kind: input, shape index: {}]   ;;  %s605_s3 = inlined_call_operand.hbm [shape: f32[1,8], index: 3, kind: output, shape index: {}]  }
   0x1   :  { %10 = vsyncpa [#allocation6], 0  ;;  %s16_s14 = sshll.u32 %s603_s1, 4  ;;  %s369_s15 = smov [#allocation4]   ;;  %s17_s14 = int_to_ptr.hbm [resolvable:$true] %s16_s14 }
   0x2   :  { %s18_s16 = sshll.u32 %s369_s15, 4  ;;  %s19_s16 = int_to_ptr.vmem [resolvable:$true] %s18_s16 }
   0x3   :  { %21 = dma.hbm_to_vmem [thread:$0]  %s17_s14, 64, %s19_s16, [#allocation5]  }
   0x4   :  { %365 = dma.done.wait [#allocation5], 64  }
   0x5   :  { %366 = vsyncadd [#allocation5], 4294967232  ;;  %v32_v0 = vlaneseq  ;;  %v28_v2 = vld [vmem:[#allocation4] sm:$0xf]  ;;  %s370_s19 = smov [#allocation7]   ;;  %s281_s23 = sshll.u32 %s605_s3, 4  ;;  %s282_s23 = int_to_ptr.hbm [resolvable:$true] %s281_s23 }
   0x6   :  { %v296_v3 = vld [vmem:[%s604_s2] ss:$0 sm:$0xff]  ;;  %v29_v4 = vmax.f32 %v28_v2, 0.0  ;;  %s279_s20 = sshll.u32 %s370_s19, 4  ;;  %s280_s20 = int_to_ptr.vmem [resolvable:$true] %s279_s20 }
   0x7   :  { %v33_v1 = vshrl.u32 %v32_v0, 7 }
   0x8   :  { %v30_v5 = vadd.f32 1.0, %v29_v4 }
   0x9   :  { %vm35_vm0 = vcmp.eq.s32.totalorder %v33_v1, %v296_v3 }
   0xa   :  { %v398_v6 = vsel %vm35_vm0, 1.0, %v30_v5  ;;  %v39_v8 = vrot.slane %v30_v5, 1  ;;  %v42_v13 = vrot.slane %v30_v5, 2  ;;  %v45_v23 = vrot.slane %v30_v5, 3 }
   0xb   :  { %v401_v7 = vadd.f32 2.0, %v398_v6  ;;  %v111_v10 = vadd.f32 1.0, %v398_v6  ;;  %v172_v17 = vrot.slane %v398_v6, 1  ;;  %v175_v18 = vrot.slane %v398_v6, 2 }
   0xc   :  { %v41_v12 = vadd.f32 %v39_v8, %v30_v5  ;;  %v178_v25 = vrot.slane %v398_v6, 3  ;;  %v425_v32 = vsel %vm35_vm0, %v30_v5, 0.0  ;;  %v431_v34 = vmul.f32 %v30_v5, %v30_v5 }
   0xd   :  { %297 = vrcp.f32 %v401_v7  ;;  %vm119_vm1 = vweird.f32 %v401_v7  ;;  %v125_v14 = vand.u32 2147483648, %v401_v7  ;;  %v123_v16 = vand.u32 2147483647, %v401_v7 }
   0xe   :  { %v412_v19 = vmul.f32 %v111_v10, %v398_v6  ;;  %v174_v21 = vadd.f32 %v172_v17, %v398_v6  ;;  %v44_v22 = vadd.f32 %v42_v13, %v41_v12  ;;  %299 = vlog2.f32 %v401_v7 }
   0xf   :  { %v126_v24 = vor.u32 1.1754944e-38, %v125_v14  ;;  %vm124_vm4 = vcmp.eq.f32.partialorder %v123_v16, 8.507059e+37  ;;  %v60_v38 = vrot.slane %v425_v32, 1  ;;  %v50_v41 = vrot.slane %v431_v34, 1 }
  0x10   :  { %v177_v27 = vadd.f32 %v175_v18, %v174_v21  ;;  %301 = vrcp.f32 %v412_v19  ;;  %v420_v30 = vadd.f32 %v45_v23, %v44_v22  ;;  %v291_v44 = vadd.f32 -0.5, %v401_v7 }
  0x11   :  { %v62_v46 = vadd.f32 %v60_v38, %v425_v32  ;;  %v63_v47 = vrot.slane %v425_v32, 2  ;;  %v461_v51 = vadd.f32 %v50_v41, %v431_v34  ;;  %v53_v52 = vrot.slane %v431_v34, 2 }
  0x12   :  { %v418_v29 = vadd.f32 %v178_v25, %v177_v27  ;;  %303 = vrcp.f32 %v420_v30  ;;  %v445_v42 = vadd.f32 1.0, %v420_v30  ;;  %v66_v53 = vrot.slane %v425_v32, 3 }
  0x13   :  { %v298_v9 = vpop.eup %297  ;;  %v153_v54 = vmul.f32 2.0, %v398_v6  ;;  %v470_v59 = vadd.f32 %v63_v47, %v62_v46  ;;  %v164_v63 = vand.u32 2147483647, %v412_v19  ;;  %v166_v0 = vand.u32 2147483648, %v412_v19 }
  0x14   :  { %v115_v11 = vmul.f32 %v298_v9, %v401_v7  ;;  %vm120_vm2 = vweird.f32 %v298_v9  ;;  %v434_v35 = vadd.f32 2.0, %v418_v29  ;;  %v300_v37 = vpop.eup %299  ;;  %v181_v39 = vadd.f32 1.0, %v418_v29 }
  0x15   :  { %vm121_vm3 = vmor %vm119_vm1, %vm120_vm2  ;;  %v447_v43 = vmul.f32 0.6931472, %v300_v37  ;;  %v482_v10 = vadd.f32 1.0, %v153_v54  ;;  %vm160_vm7 = vweird.f32 %v412_v19  ;;  %vm489_vm8 = vcmp.eq.f32.partialorder %v164_v63, 8.507059e+37 }
  0x16   :  { %v116_v15 = vsub.f32 1.0, %v115_v11  ;;  %v440_v40 = vpop.eup %301  ;;  %305 = vrcp.f32 %v434_v35  ;;  %v455_v49 = vmul.f32 %v181_v39, %v418_v29  ;;  %v195_v1 = vand.u32 2147483648, %v434_v35 }
  0x17   :  { %v156_v48 = vmul.f32 %v440_v40, %v412_v19  ;;  %307 = vlog2.f32 %v412_v19  ;;  %v133_v56 = vmul.f32 %v291_v44, %v447_v43  ;;  %vm189_vm5 = vweird.f32 %v434_v35 }
  0x18   :  { %v117_v20 = vmul.f32 %v298_v9, %v116_v15  ;;  %v458_v50 = vpop.eup %303  ;;  %309 = vrcp.f32 %v445_v42  ;;  %v193_v3 = vand.u32 2147483647, %v434_v35  ;;  %v167_v16 = vor.u32 1.1754944e-38, %v166_v0 }
  0x19   :  { %v157_v60 = vsub.f32 1.0, %v156_v48  ;;  %311 = vrcp.f32 %v455_v49  ;;  %v70_v62 = vmul.f32 %v458_v50, %v420_v30  ;;  %v134_v5 = vsub.f32 %v133_v56, %v401_v7 }
  0x1a   :  { %v118_v26 = vadd.f32 %v298_v9, %v117_v20  ;;  %313 = vlog2.f32 %v434_v35  ;;  %v196_v17 = vor.u32 1.1754944e-38, %v195_v1  ;;  %vm161_vm10 = vweird.f32 %v440_v40 }
  0x1b   :  { %v158_v11 = vmul.f32 %v440_v40, %v157_v60  ;;  %v71_v14 = vsub.f32 1.0, %v70_v62  ;;  %vm194_vm11 = vcmp.eq.f32.partialorder %v193_v3, 8.507059e+37  ;;  %v135_v22 = vadd.f32 0.9189385, %v134_v5  ;;  %vm512_vm14 = vmor %vm160_vm7, %vm161_vm10 }
  0x1c   :  { %v122_v28 = vsel %vm121_vm3, %v298_v9, %v118_v26  ;;  %v306_v55 = vpop.eup %305  ;;  %vm230_vm12 = vweird.f32 %v455_v49  ;;  %vm74_vm13 = vweird.f32 %v420_v30  ;;  %v234_v19 = vand.u32 2147483647, %v455_v49 }
  0x1d   :  { %v422_v31 = vsel %vm124_vm4, %v126_v24, %v122_v28  ;;  %v185_v61 = vmul.f32 %v306_v55, %v434_v35  ;;  %vm190_vm6 = vweird.f32 %v306_v55  ;;  %v308_v4 = vpop.eup %307  ;;  %v159_v27 = vadd.f32 %v440_v40, %v158_v11 }
  0x1e   :  { %v429_v33 = vmul.f32 %v422_v31, %v422_v31  ;;  %v487_v13 = vpop.eup %309  ;;  %vm496_vm9 = vmor %vm189_vm5, %vm190_vm6  ;;  %v143_v20 = vmul.f32 0.6931472, %v308_v4  ;;  %v145_v26 = vmul.f32 0.5, %v422_v31  ;;  %v72_v41 = vmul.f32 %v458_v50, %v71_v14 }
  0x1f   :  { %v186_v2 = vsub.f32 1.0, %v185_v61  ;;  %v312_v18 = vpop.eup %311  ;;  %v86_v44 = vmul.f32 %v487_v13, %v445_v42  ;;  %v223_v48 = vmul.f32 2.0, %v418_v29  ;;  %v292_v56 = vadd.f32 -0.5, %v434_v35 }
  0x20   :  { %v136_v36 = vmul.f32 0.0007936508, %v429_v33  ;;  %v147_v58 = vmul.f32 0.003968254, %v429_v33  ;;  %v226_v25 = vmul.f32 %v312_v18, %v455_v49  ;;  %vm231_vm15 = vweird.f32 %v312_v18  ;;  %v314_v39 = vpop.eup %313 }
  0x21   :  { %v187_v12 = vmul.f32 %v306_v55, %v186_v2  ;;  %vm533_vm0 = vmor %vm230_vm12, %vm231_vm15  ;;  %v146_v61 = vsub.f32 %v447_v43, %v145_v26  ;;  %v201_v62 = vmul.f32 0.6931472, %v314_v39  ;;  %vm235_vm1 = vcmp.eq.f32.partialorder %v234_v19, 8.507059e+37 }
  0x22   :  { %v137_v45 = vsub.f32 0.0027777778, %v136_v36  ;;  %v148_v9 = vsub.f32 0.008333334, %v147_v58  ;;  %v227_v38 = vsub.f32 1.0, %v226_v25  ;;  %v224_v11 = vadd.f32 1.0, %v223_v48 }
  0x23   :  { %v188_v21 = vadd.f32 %v306_v55, %v187_v12  ;;  %vm75_vm2 = vweird.f32 %v458_v50  ;;  %v78_v12 = vand.u32 2147483647, %v420_v30  ;;  %v80_v14 = vand.u32 2147483648, %v420_v30 }
  0x24   :  { %v138_v57 = vmul.f32 %v137_v45, %v429_v33  ;;  %v149_v24 = vmul.f32 %v148_v9, %v429_v33  ;;  %v228_v54 = vmul.f32 %v312_v18, %v227_v38  ;;  %315 = vlog2.f32 %v455_v49  ;;  %vm555_vm3 = vmor %vm74_vm13, %vm75_vm2 }
  0x25   :  { %v192_v28 = vsel %vm496_vm9, %v306_v55, %v188_v21  ;;  %v163_v55 = vsel %vm512_vm14, %v440_v40, %v159_v27  ;;  %v55_v26 = vadd.f32 %v53_v52, %v461_v51  ;;  %v56_v27 = vrot.slane %v431_v34, 3 }
  0x26   :  { %v139_v8 = vsub.f32 0.083333336, %v138_v57  ;;  %v516_v37 = vsel %vm194_vm11, %v196_v17, %v192_v28  ;;  %v150_v47 = vsub.f32 0.083333336, %v149_v24  ;;  %v229_v29 = vadd.f32 %v312_v18, %v228_v54 }
  0x27   :  { %v199_v45 = vmul.f32 %v516_v37, %v516_v37  ;;  %v215_v1 = vmul.f32 0.5, %v516_v37  ;;  %v168_v4 = vsel %vm489_vm8, %v167_v16, %v163_v55  ;;  %v87_v17 = vsub.f32 1.0, %v86_v44 }
  0x28   :  { %v140_v23 = vmul.f32 %v139_v8, %v422_v31  ;;  %v236_v31 = vand.u32 2147483648, %v455_v49  ;;  %v151_v3 = vmul.f32 %v150_v47, %v429_v33  ;;  %v233_v5 = vsel %vm533_vm0, %v312_v18, %v229_v29 }
  0x29   :  { %v206_v57 = vmul.f32 0.0007936508, %v199_v45  ;;  %v217_v58 = vmul.f32 0.003968254, %v199_v45  ;;  %v203_v8 = vmul.f32 %v292_v56, %v201_v62  ;;  %v216_v33 = vsub.f32 %v201_v62, %v215_v1 }
  0x2a   :  { %v141_v46 = vadd.f32 %v140_v23, %v135_v22  ;;  %v237_v63 = vor.u32 1.1754944e-38, %v236_v31  ;;  %v73_v16 = vadd.f32 %v458_v50, %v72_v41  ;;  %v169_v18 = vmul.f32 %v168_v4, %v482_v10  ;;  %v316_v34 = vpop.eup %315 }
  0x2b   :  { %v207_v0 = vsub.f32 0.0027777778, %v206_v57  ;;  %v218_v40 = vsub.f32 0.008333334, %v217_v58  ;;  %v204_v23 = vsub.f32 %v203_v8, %v434_v35  ;;  %v68_v10 = vadd.f32 %v66_v53, %v470_v59 }
  0x2c   :  { %v539_v2 = vsub.f32 %v141_v46, %v143_v20  ;;  %v238_v7 = vsel %vm235_vm1, %v237_v63, %v233_v5  ;;  %v152_v20 = vsub.f32 %v146_v61, %v151_v3  ;;  %vm567_vm4 = vcmp.eq.f32.partialorder %v78_v12, 8.507059e+37 }
  0x2d   :  { %v208_v43 = vmul.f32 %v207_v0, %v199_v45  ;;  %v219_v9 = vmul.f32 %v218_v40, %v199_v45  ;;  %v239_v49 = vmul.f32 %v238_v7, %v224_v11  ;;  %v81_v36 = vor.u32 1.1754944e-38, %v80_v14 }
  0x2e   :  { %v242_v21 = vrot.slane %v539_v2, 1  ;;  %v77_v35 = vsel %vm555_vm3, %v458_v50, %v73_v16  ;;  %v88_v31 = vmul.f32 %v487_v13, %v87_v17  ;;  %v170_v39 = vsub.f32 %v152_v20, %v169_v18 }
  0x2f   :  { %v220_v15 = vsub.f32 0.083333336, %v219_v9  ;;  %v209_v24 = vsub.f32 0.083333336, %v208_v43  ;;  %v245_v51 = vrot.slane %v539_v2, 2  ;;  %v58_v41 = vadd.f32 %v56_v27, %v55_v26 }
  0x30   :  { %v205_v52 = vadd.f32 0.9189385, %v204_v23  ;;  %v244_v59 = vadd.f32 %v242_v21, %v539_v2  ;;  %vm90_vm5 = vweird.f32 %v445_v42  ;;  %vm91_vm6 = vweird.f32 %v487_v13 }
  0x31   :  { %v221_v25 = vmul.f32 %v220_v15, %v199_v45  ;;  %v210_v32 = vmul.f32 %v209_v24, %v516_v37  ;;  %v101_v44 = vmul.f32 2.0, %v68_v10  ;;  %v82_v50 = vsel %vm567_vm4, %v81_v36, %v77_v35  ;;  %vm588_vm7 = vmor %vm90_vm5, %vm91_vm6 }
  0x32   :  { %v106_v45 = vmul.f32 %v420_v30, %v420_v30  ;;  %v293_v19 = vadd.f32 -1.0, %v398_v6  ;;  %v89_v37 = vadd.f32 %v487_v13, %v88_v31  ;;  %v94_v47 = vand.u32 2147483647, %v445_v42 }
  0x33   :  { %v222_v38 = vsub.f32 %v216_v33, %v221_v25  ;;  %v96_v48 = vand.u32 2147483648, %v445_v42  ;;  %v213_v54 = vmul.f32 0.6931472, %v316_v34  ;;  %v211_v56 = vadd.f32 %v210_v32, %v205_v52 }
  0x34   :  { %v247_v57 = vadd.f32 %v245_v51, %v244_v59  ;;  %v248_v58 = vrot.slane %v539_v2, 3  ;;  %v102_v30 = vmul.f32 %v101_v44, %v82_v50  ;;  %v100_v61 = vmul.f32 %v82_v50, %v82_v50 }
  0x35   :  { %v240_v53 = vsub.f32 %v222_v38, %v239_v49  ;;  %v107_v6 = vsub.f32 %v106_v45, %v58_v41  ;;  %v93_v29 = vsel %vm588_vm7, %v487_v13, %v89_v37  ;;  %vm95_vm8 = vcmp.eq.f32.partialorder %v94_v47, 8.507059e+37 }
  0x36   :  { %v97_v42 = vor.u32 1.1754944e-38, %v96_v48  ;;  %v214_v63 = vsub.f32 %v211_v56, %v213_v54  ;;  %v250_v0 = vadd.f32 %v248_v58, %v247_v57  ;;  %v103_v3 = vsub.f32 1.0, %v102_v30 }
  0x37   :  { %v253_v46 = vperm.slane %v240_v53, 0  ;;  %v104_v4 = vmul.f32 %v100_v61, %v58_v41  ;;  %v108_v5 = vmul.f32 %v107_v6, %v100_v61  ;;  %v269_v13 = vstv %s602_s0 }
  0x38   :  { %v98_v43 = vsel %vm95_vm8, %v97_v42, %v93_v29  ;;  %v251_v9 = vsub.f32 %v214_v63, %v250_v0  ;;  %vm272_vm9 = vcmask 57344  }
  0x39   :  { %v254_v60 = vsub.f32 %v170_v39, %v253_v46  ;;  %v105_v12 = vadd.f32 %v104_v4, %v103_v3  ;;  %v109_v14 = vmul.f32 %v108_v5, %v98_v43 }
  0x3b   :  { %v255_v62 = vmul.f32 %v293_v19, %v254_v60  ;;  %v110_v33 = vadd.f32 %v109_v14, %v105_v12 }
  0x3d   :  { %v257_v1 = vrot.slane %v255_v62, 1  ;;  %v260_v40 = vrot.slane %v255_v62, 2  ;;  %v263_v2 = vrot.slane %v255_v62, 3 }
  0x3f   :  { %v259_v8 = vadd.f32 %v257_v1, %v255_v62 }
  0x41   :  { %v262_v11 = vadd.f32 %v260_v40, %v259_v8 }
  0x43   :  { %v265_v7 = vadd.f32 %v263_v2, %v262_v11 }
  0x45   :  { %v266_v17 = vadd.f32 %v265_v7, %v251_v9 }
  0x47   :  { %v267_v15 = vadd.f32 -1.7917595, %v266_v17 }
  0x49   :  { %v270_v16 = vmul.f32 %v269_v13, %v267_v15 }
  0x4b   :  { %v271_v20 = vadd.f32 %v270_v16, %v110_v33 }
  0x4d   :  { %273 = vst.msk [vmem:[#allocation7] sm:$0x1] %vm272_vm9, %v271_v20 }
  0x4e   :  { %284 = dma.vmem_to_hbm [thread:$0]  %s280_s20, 16, %s282_s23, [#allocation6]  }
  0x4f   :  { %367 = dma.done.wait [#allocation6], 16  }
  0x50   :  { %368 = vsyncadd [#allocation6], 4294967280 }
  0x51   :  { %289 = vsyncpa [#allocation5], 1 }
  0x52   :  { %290 = vsyncpa [#allocation6], 1 }

</bundles_post_ra>
